<compile_context>
chip_gen: v6e
topology: v6e:2x2x1
jax: 0.10.0
libtpu: 0.0.40
codegen_flags: <defaults>
</compile_context>

<pallas_src>
import jax
import jax.numpy as jnp
from jax import lax
from jax.experimental import pallas as pl
from jax.experimental.pallas import tpu as pltpu

_LANE = 128


def _softplus(z):
    # Numerically stable softplus: log1p(exp(-|z|)) + max(z, 0)
    return jnp.log1p(jnp.exp(-jnp.abs(z))) + jnp.maximum(z, 0.0)


def shift_encoder_kernel(x_ref, w1_ref, b1_ref, whead_ref, bhead_ref,
                         out_ref, acc_ref):
    k = pl.program_id(1)

    @pl.when(k == 0)
    def _():
        acc_ref[...] = jnp.zeros_like(acc_ref)

    # Dominant matmul: (tb, tk) @ (tk, dim_mid), f32 accumulation on the MXU.
    acc_ref[...] += jnp.dot(x_ref[...], w1_ref[...],
                            preferred_element_type=jnp.float32)

    @pl.when(k == pl.num_programs(1) - 1)
    def _():
        # Bias + ReLU in f32 (works on every generation incl. v5e's f32-only VPU).
        h = jnp.maximum(acc_ref[...] + b1_ref[...], 0.0)            # (tb, dim_mid)

        # Fused heads, emitted directly in the lane-dense (2, tb) layout:
        # contract whead's dim_mid axis against h's dim_mid axis so the MXU
        # writes (2, tb) -- no (tb, 2) intermediate, no XLU transpose.
        z = lax.dot_general(
            whead_ref[...], h,
            dimension_numbers=(((0,), (1,)), ((), ())),
            preferred_element_type=jnp.float32)                      # (2, tb)
        z = z + bhead_ref[...]                                       # (2, 1) bias

        # Row 0 = loc (identity), row 1 = scale (softplus).
        row = lax.broadcasted_iota(jnp.int32, z.shape, 0)
        out = jnp.where(row == 1, _softplus(z), z)
        out_ref[...] = out.astype(out_ref.dtype)


def _round_down_multiple(x, m):
    return (x // m) * m


def _pick_tiles(B, dim_in, itemsize):
    """Pick (tb, tk): batch tile ~4 MiB (amortizes grid-step overhead), grid>=2
    for B>=256 (v7x dual TC), and a K split when a full-K x tile gets big."""
    if B <= _LANE:
        tb = B
    else:
        bytes_per_row = max(1, dim_in * itemsize)
        target_rows = max(_LANE, (4 * 2 ** 20) // bytes_per_row)
        tb = max(_LANE, _round_down_multiple(min(target_rows, B), _LANE))
        if B >= 2 * _LANE:
            # Keep at least 2 batch tiles so the "parallel" axis can shard
            # across both v7x TensorCores (harmless on single-TC v5e/v6e).
            tb = min(tb, max(_LANE, _round_down_multiple(B // 2, _LANE)))

    tk = dim_in
    if dim_in % _LANE == 0 and tb * dim_in * itemsize > 8 * 2 ** 20:
        # Stream w1 / x over dim_in in ~4 MiB chunks; tk must divide dim_in
        # exactly (partial K blocks would add garbage into the accumulator).
        budget_cols = max(_LANE, (4 * 2 ** 20) // max(1, tb * itemsize))
        tk = _round_down_multiple(min(budget_cols, dim_in), _LANE)
        while dim_in % tk != 0:
            tk -= _LANE
    return tb, tk


def shift_encoder(x, params, *, tb=None, tk=None):
    """x: (B, dim_in). params: pre-transposed weights/biases.

    Returns (loc, scale), each (B, 1) float32.
    """
    B, dim_in = x.shape
    w1 = params["w1"]
    dim_mid = w1.shape[1]
    if w1.dtype != x.dtype:
        # Match the (small) weight dtype to the activation dtype so a bf16 x
        # stream uses the bf16-native MXU.  Note: x itself is never cast in
        # the wrapper -- an unfused cast would add an extra HBM pass over the
        # dominant stream.
        w1 = w1.astype(x.dtype)

    # Fused 2-wide head: precomputed in init_params, built here only if absent.
    whead = params.get("whead")
    if whead is None:
        whead = jnp.concatenate([params["wloc"], params["wscale"]], axis=1)
    bhead = params.get("bhead")
    if bhead is None:
        bhead = jnp.concatenate([params["bloc"], params["bscale"]], axis=0)
    b1 = params["b1"]

    auto_tb, auto_tk = _pick_tiles(B, dim_in, x.dtype.itemsize)
    if tb is None:
        tb = auto_tb
    if tk is None:
        tk = auto_tk
    assert tb == B or tb % _LANE == 0, "tb must equal B or be a multiple of 128"
    assert tk == dim_in or (tk % _LANE == 0 and dim_in % tk == 0), \
        "tk must equal dim_in or be a lane-multiple exact divisor of dim_in"

    num_b = pl.cdiv(B, tb)
    num_k = dim_in // tk
    grid = (num_b, num_k)

    # Scoped-VMEM estimate; only raise the limit when big tiles demand it
    # (defaults: 16 MiB on v5e, 32 MiB on v6e/v7x).
    est = (2 * tb * tk * x.dtype.itemsize            # double-buffered x tile
           + 2 * tk * dim_mid * w1.dtype.itemsize    # w1 tile (<=2 buffers)
           + tb * dim_mid * 4                        # f32 accumulator scratch
           + 2 * 2 * tb * 4                          # output slab
           + 4 * (3 * dim_mid + 2))                  # small biases / head
    vmem_limit = min(2 * est, 96 * 2 ** 20) if est > 30 * 2 ** 20 else None

    def run(single_buffer_consts):
        def const_spec(shape):
            idx = lambda i, k: (0,) * len(shape)
            if single_buffer_consts:
                # Constant-index parameter: a single VMEM copy suffices.
                return pl.BlockSpec(shape, idx, pipeline_mode=pl.Buffered(1))
            return pl.BlockSpec(shape, idx)

        w1_spec = (const_spec((tk, dim_mid)) if num_k == 1
                   else pl.BlockSpec((tk, dim_mid), lambda i, k: (k, 0)))
        in_specs = [
            pl.BlockSpec((tb, tk), lambda i, k: (i, k)),  # x tile (pipelined)
            w1_spec,                                      # w1 (resident / K-streamed)
            const_spec((1, dim_mid)),                     # b1
            const_spec((dim_mid, 2)),                     # fused head weights
            const_spec((2, 1)),                           # fused head biases
        ]
        return pl.pallas_call(
            shift_encoder_kernel,
            out_shape=jax.ShapeDtypeStruct((2, B), jnp.float32),
            grid_spec=pltpu.PrefetchScalarGridSpec(
                num_scalar_prefetch=0,
                grid=grid,
                in_specs=in_specs,
                out_specs=pl.BlockSpec((2, tb), lambda i, k: (0, i)),  # lane-dense slab
                scratch_shapes=[pltpu.VMEM((tb, dim_mid), jnp.float32)],
            ),
            compiler_params=pltpu.CompilerParams(
                dimension_semantics=("parallel", "arbitrary"),
                vmem_limit_bytes=vmem_limit),
        )(x, w1, b1, whead, bhead)

    try:
        out = run(True)
    except Exception:
        # TODO(synk): jax builds without per-BlockSpec pipeline_mode /
        # Buffered(1); fall back to default double-buffered parameter blocks.
        out = run(False)

    loc = out[0].reshape(B, 1)
    scale = out[1].reshape(B, 1)
    return loc, scale


def init_params(key, dim_in):
    """Deterministic init mimicking torch.nn.Linear (uniform +-1/sqrt(fan_in)).

    Weights are stored transposed: (in_features, out_features).
    """
    dim_mid = int(dim_in ** 0.5)  # matches int(sqrt(dim_in)) in the module
    k1, k2, k3, k4, k5, k6 = jax.random.split(key, 6)
    lim1 = 1.0 / (dim_in ** 0.5)
    lim2 = 1.0 / (dim_mid ** 0.5)
    params = {
        "w1": jax.random.uniform(k1, (dim_in, dim_mid), jnp.float32, -lim1, lim1),
        "b1": jax.random.uniform(k2, (1, dim_mid), jnp.float32, -lim1, lim1),
        "wloc": jax.random.uniform(k3, (dim_mid, 1), jnp.float32, -lim2, lim2),
        "bloc": jax.random.uniform(k4, (1, 1), jnp.float32, -lim2, lim2),
        "wscale": jax.random.uniform(k5, (dim_mid, 1), jnp.float32, -lim2, lim2),
        "bscale": jax.random.uniform(k6, (1, 1), jnp.float32, -lim2, lim2),
    }
    # Precompute the fused 2-wide head once (avoids two tiny XLA concats in
    # front of every call of a microsecond-scale kernel).
    params["whead"] = jnp.concatenate([params["wloc"], params["wscale"]], axis=1)
    params["bhead"] = jnp.concatenate([params["bloc"], params["bscale"]], axis=0)
    return params, dim_mid


def reference(x, p):
    h = jnp.maximum(x @ p["w1"] + p["b1"], 0.0)
    loc = h @ p["wloc"] + p["bloc"]
    scale = jax.nn.softplus(h @ p["wscale"] + p["bscale"])
    return loc, scale


if __name__ == "__main__":
    key = jax.random.PRNGKey(0)
    kx, kp, kx2, kp2, kx4, kp4 = jax.random.split(key, 6)

    # 1) Small toy shape matching the module: dim_mid = int(sqrt(16)) = 4.
    B, dim_in = 8, 16
    x = jax.random.normal(kx, (B, dim_in), jnp.float32)
    params, _ = init_params(kp, dim_in)
    loc, scale = shift_encoder(x, params)
    jax.block_until_ready((loc, scale))
    loc_ref, scale_ref = reference(x, params)
    assert loc.shape == (B, 1) and scale.shape == (B, 1)
    assert jnp.allclose(loc, loc_ref, atol=1e-5, rtol=1e-5)
    assert jnp.allclose(scale, scale_ref, atol=1e-5, rtol=1e-5)
    assert bool(jnp.all(scale > 0.0))

    # 2) Multi-tile lane-dense path: B=384, dim_in=64 -> auto tb=128, 3 tiles.
    B2, dim_in2 = 384, 64  # dim_mid = 8
    x2 = jax.random.normal(kx2, (B2, dim_in2), jnp.float32)
    params2, _ = init_params(kp2, dim_in2)
    loc2, scale2 = shift_encoder(x2, params2)
    jax.block_until_ready((loc2, scale2))
    loc2_ref, scale2_ref = reference(x2, params2)
    assert jnp.allclose(loc2, loc2_ref, atol=1e-4, rtol=1e-4)
    assert jnp.allclose(scale2, scale2_ref, atol=1e-4, rtol=1e-4)
    assert bool(jnp.all(scale2 > 0.0))

    # 3) bf16 producer path: x arrives in bf16 from upstream (no wrapper cast
    #    of the x stream); weights matched to bf16, f32 accumulation kept.
    x2_bf16 = x2.astype(jnp.bfloat16)
    loc3, scale3 = shift_encoder(x2_bf16, params2)
    jax.block_until_ready((loc3, scale3))
    assert jnp.allclose(loc3, loc2_ref, atol=1e-1, rtol=1e-1)
    assert bool(jnp.all(jnp.isfinite(loc3))) and bool(jnp.all(jnp.isfinite(scale3)))
    assert bool(jnp.all(scale3 > 0.0))

    # 4) K-split accumulator path: dim_in=256 (dim_mid=16) with tk=128 ->
    #    grid=(2, 2), f32 accumulator scratch, heads on the last K step.
    B4, dim_in4 = 256, 256
    x4 = jax.random.normal(kx4, (B4, dim_in4), jnp.float32)
    params4, _ = init_params(kp4, dim_in4)
    loc4, scale4 = shift_encoder(x4, params4, tk=128)
    jax.block_until_ready((loc4, scale4))
    loc4_ref, scale4_ref = reference(x4, params4)
    assert jnp.allclose(loc4, loc4_ref, atol=1e-4, rtol=1e-4)
    assert jnp.allclose(scale4, scale4_ref, atol=1e-4, rtol=1e-4)
    assert bool(jnp.all(scale4 > 0.0))

    print("KERNEL_OK")
</pallas_src>

<mosaic_0001>
module attributes {stable_mosaic.version = 11 : i64} {
  func.func @shift_encoder_kernel(%arg0: i32, %arg1: i32, %arg2: memref<8x16xf32, #tpu.memory_space<vmem>>, %arg3: memref<16x4xf32, #tpu.memory_space<vmem>>, %arg4: memref<1x4xf32, #tpu.memory_space<vmem>>, %arg5: memref<4x2xf32, #tpu.memory_space<vmem>>, %arg6: memref<2x1xf32, #tpu.memory_space<vmem>>, %arg7: memref<2x8xf32, #tpu.memory_space<vmem>>, %arg8: memref<8x4xf32, #tpu.memory_space<vmem>>) attributes {dimension_semantics = [#tpu.dimension_semantics<parallel>, #tpu.dimension_semantics<arbitrary>], iteration_bounds = array<i64: 1, 1>, scalar_prefetch = 0 : i64, scratch_operands = 1 : i64, tpu.core_type = #tpu.core_type<tc>, window_params = [{transform_indices = @transform_0, window_bounds = array<i64: 8, 16>}, {pipeline_mode = #tpu.pipeline_mode<synchronous>, transform_indices = @transform_1, window_bounds = array<i64: 16, 4>}, {pipeline_mode = #tpu.pipeline_mode<synchronous>, transform_indices = @transform_2, window_bounds = array<i64: 1, 4>}, {pipeline_mode = #tpu.pipeline_mode<synchronous>, transform_indices = @transform_3, window_bounds = array<i64: 4, 2>}, {pipeline_mode = #tpu.pipeline_mode<synchronous>, transform_indices = @transform_4, window_bounds = array<i64: 2, 1>}, {transform_indices = @transform_5, window_bounds = array<i64: 2, 8>}]} {
    %c0_i32 = arith.constant 0 : i32
    %0 = arith.cmpi eq, %arg1, %c0_i32 : i32
    %1 = arith.extui %0 : i1 to i32
    %c0_i32_0 = arith.constant 0 : i32
    %2 = arith.cmpi ne, %1, %c0_i32_0 : i32
    scf.if %2 {
      %cst_10 = arith.constant 0.000000e+00 : f32
      %12 = vector.broadcast %cst_10 : f32 to vector<8x4xf32>
      %c0_11 = arith.constant 0 : index
      %c0_12 = arith.constant 0 : index
      %13 = vector.load %arg8[%c0_11, %c0_12] : memref<8x4xf32, #tpu.memory_space<vmem>>, vector<8x4xf32>
      tpu.vector_store %arg8[%c0_11, %c0_12], %12 {strides = array<i32>} : memref<8x4xf32, #tpu.memory_space<vmem>>, vector<8x4xf32>,
    } else {
    }
    %c0 = arith.constant 0 : index
    %c0_1 = arith.constant 0 : index
    %3 = vector.load %arg8[%c0, %c0_1] : memref<8x4xf32, #tpu.memory_space<vmem>>, vector<8x4xf32>
    %c0_2 = arith.constant 0 : index
    %c0_3 = arith.constant 0 : index
    %4 = vector.load %arg2[%c0_2, %c0_3] : memref<8x16xf32, #tpu.memory_space<vmem>>, vector<8x16xf32>
    %c0_4 = arith.constant 0 : index
    %c0_5 = arith.constant 0 : index
    %5 = vector.load %arg3[%c0_4, %c0_5] : memref<16x4xf32, #tpu.memory_space<vmem>>, vector<16x4xf32>
    %cst = arith.constant dense<0.000000e+00> : vector<8x4xf32>
    %6 = tpu.matmul %4, %5, %cst {dimension_numbers = #tpu.dot_dimension_numbers<[1], [0], [0], [1], [0, 0, 1, 1], [], []>} : vector<8x16xf32>, vector<16x4xf32>, vector<8x4xf32> -> vector<8x4xf32>
    %7 = arith.addf %3, %6 : vector<8x4xf32>
    %c0_6 = arith.constant 0 : index
    %c0_7 = arith.constant 0 : index
    %8 = vector.load %arg8[%c0_6, %c0_7] : memref<8x4xf32, #tpu.memory_space<vmem>>, vector<8x4xf32>
    tpu.vector_store %arg8[%c0_6, %c0_7], %7 {strides = array<i32>} : memref<8x4xf32, #tpu.memory_space<vmem>>, vector<8x4xf32>,
    %c0_i32_8 = arith.constant 0 : i32
    %9 = arith.cmpi eq, %arg1, %c0_i32_8 : i32
    %10 = arith.extui %9 : i1 to i32
    %c0_i32_9 = arith.constant 0 : i32
    %11 = arith.cmpi ne, %10, %c0_i32_9 : i32
    scf.if %11 {
      %c0_10 = arith.constant 0 : index
      %c0_11 = arith.constant 0 : index
      %12 = vector.load %arg8[%c0_10, %c0_11] : memref<8x4xf32, #tpu.memory_space<vmem>>, vector<8x4xf32>
      %c0_12 = arith.constant 0 : index
      %c0_13 = arith.constant 0 : index
      %13 = vector.load %arg4[%c0_12, %c0_13] : memref<1x4xf32, #tpu.memory_space<vmem>>, vector<1x4xf32>
      %14 = vector.broadcast %13 : vector<1x4xf32> to vector<8x4xf32>
      %15 = arith.addf %12, %14 : vector<8x4xf32>
      %cst_14 = arith.constant 0.000000e+00 : f32
      %16 = vector.broadcast %cst_14 : f32 to vector<8x4xf32>
      %17 = arith.maximumf %15, %16 : vector<8x4xf32>
      %c0_15 = arith.constant 0 : index
      %c0_16 = arith.constant 0 : index
      %18 = vector.load %arg5[%c0_15, %c0_16] : memref<4x2xf32, #tpu.memory_space<vmem>>, vector<4x2xf32>
      %cst_17 = arith.constant dense<0.000000e+00> : vector<2x8xf32>
      %19 = tpu.matmul %18, %17, %cst_17 {dimension_numbers = #tpu.dot_dimension_numbers<[0], [1], [1], [0], [0, 1, 1, 0], [], []>} : vector<4x2xf32>, vector<8x4xf32>, vector<2x8xf32> -> vector<2x8xf32>
      %c0_18 = arith.constant 0 : index
      %c0_19 = arith.constant 0 : index
      %20 = vector.load %arg6[%c0_18, %c0_19] : memref<2x1xf32, #tpu.memory_space<vmem>>, vector<2x1xf32>
      %21 = vector.broadcast %20 : vector<2x1xf32> to vector<2x8xf32>
      %22 = arith.addf %19, %21 : vector<2x8xf32>
      %23 = tpu.iota {dimensions = array<i32: 0>} : vector<2x8xi32>
      %c1_i32 = arith.constant 1 : i32
      %24 = vector.broadcast %c1_i32 : i32 to vector<2x8xi32>
      %25 = arith.cmpi eq, %23, %24 : vector<2x8xi32>
      %26 = math.absf %22 : vector<2x8xf32>
      %cst_20 = arith.constant 0.000000e+00 : f32
      %27 = vector.broadcast %cst_20 : f32 to vector<2x8xf32>
      %28 = arith.subf %27, %26 : vector<2x8xf32>
      %29 = math.exp %28 : vector<2x8xf32>
      %30 = math.log1p %29 : vector<2x8xf32>
      %cst_21 = arith.constant 0.000000e+00 : f32
      %31 = vector.broadcast %cst_21 : f32 to vector<2x8xf32>
      %32 = arith.maximumf %22, %31 : vector<2x8xf32>
      %33 = arith.addf %30, %32 : vector<2x8xf32>
      %34 = arith.select %25, %33, %22 : vector<2x8xi1>, vector<2x8xf32>
      %c0_22 = arith.constant 0 : index
      %c0_23 = arith.constant 0 : index
      %35 = vector.load %arg7[%c0_22, %c0_23] : memref<2x8xf32, #tpu.memory_space<vmem>>, vector<2x8xf32>
      tpu.vector_store %arg7[%c0_22, %c0_23], %34 {strides = array<i32>} : memref<2x8xf32, #tpu.memory_space<vmem>>, vector<2x8xf32>,
    } else {
    }
    return
  }
  func.func @transform_0(%arg0: i32, %arg1: i32) -> (i32, i32) {
    %c0_i32 = arith.constant 0 : i32
    return %arg0, %arg1 : i32, i32
  }
  func.func @transform_1(%arg0: i32, %arg1: i32) -> (i32, i32) {
    %c0_i32 = arith.constant 0 : i32
    %c0_i32_0 = arith.constant 0 : i32
    %c0_i32_1 = arith.constant 0 : i32
    return %c0_i32, %c0_i32_0 : i32, i32
  }
  func.func @transform_2(%arg0: i32, %arg1: i32) -> (i32, i32) {
    %c0_i32 = arith.constant 0 : i32
    %c0_i32_0 = arith.constant 0 : i32
    %c0_i32_1 = arith.constant 0 : i32
    return %c0_i32, %c0_i32_0 : i32, i32
  }
  func.func @transform_3(%arg0: i32, %arg1: i32) -> (i32, i32) {
    %c0_i32 = arith.constant 0 : i32
    %c0_i32_0 = arith.constant 0 : i32
    %c0_i32_1 = arith.constant 0 : i32
    return %c0_i32, %c0_i32_0 : i32, i32
  }
  func.func @transform_4(%arg0: i32, %arg1: i32) -> (i32, i32) {
    %c0_i32 = arith.constant 0 : i32
    %c0_i32_0 = arith.constant 0 : i32
    %c0_i32_1 = arith.constant 0 : i32
    return %c0_i32, %c0_i32_0 : i32, i32
  }
  func.func @transform_5(%arg0: i32, %arg1: i32) -> (i32, i32) {
    %c0_i32 = arith.constant 0 : i32
    %c0_i32_0 = arith.constant 0 : i32
    return %c0_i32, %arg0 : i32, i32
  }
}

module attributes {stable_mosaic.version = 11 : i64} {
  func.func @shift_encoder_kernel(%arg0: i32, %arg1: i32, %arg2: memref<8x16xf32, #tpu.memory_space<vmem>>, %arg3: memref<16x4xf32, #tpu.memory_space<vmem>>, %arg4: memref<1x4xf32, #tpu.memory_space<vmem>>, %arg5: memref<4x2xf32, #tpu.memory_space<vmem>>, %arg6: memref<2x1xf32, #tpu.memory_space<vmem>>, %arg7: memref<2x8xf32, #tpu.memory_space<vmem>>, %arg8: memref<8x4xf32, #tpu.memory_space<vmem>>) attributes {dimension_semantics = [#tpu.dimension_semantics<parallel>, #tpu.dimension_semantics<arbitrary>], iteration_bounds = array<i64: 1, 1>, scalar_prefetch = 0 : i64, scratch_operands = 1 : i64, tpu.core_type = #tpu.core_type<tc>, window_params = [{transform_indices = @transform_0, window_bounds = array<i64: 8, 16>}, {pipeline_mode = #tpu.pipeline_mode<synchronous>, transform_indices = @transform_1, window_bounds = array<i64: 16, 4>}, {pipeline_mode = #tpu.pipeline_mode<synchronous>, transform_indices = @transform_2, window_bounds = array<i64: 1, 4>}, {pipeline_mode = #tpu.pipeline_mode<synchronous>, transform_indices = @transform_3, window_bounds = array<i64: 4, 2>}, {pipeline_mode = #tpu.pipeline_mode<synchronous>, transform_indices = @transform_4, window_bounds = array<i64: 2, 1>}, {transform_indices = @transform_5, window_bounds = array<i64: 2, 8>}]} {
    %c0_i32 = arith.constant 0 : i32
    %0 = arith.cmpi eq, %arg1, %c0_i32 : i32
    %1 = arith.extui %0 : i1 to i32
    %c0_i32_0 = arith.constant 0 : i32
    %2 = arith.cmpi ne, %1, %c0_i32_0 : i32
    scf.if %2 {
      %cst_10 = arith.constant 0.000000e+00 : f32
      %12 = vector.broadcast %cst_10 : f32 to vector<8x4xf32>
      %c0_11 = arith.constant 0 : index
      %c0_12 = arith.constant 0 : index
      %13 = vector.load %arg8[%c0_11, %c0_12] : memref<8x4xf32, #tpu.memory_space<vmem>>, vector<8x4xf32>
      tpu.vector_store %arg8[%c0_11, %c0_12], %12 {strides = array<i32>} : memref<8x4xf32, #tpu.memory_space<vmem>>, vector<8x4xf32>,
    } else {
    }
    %c0 = arith.constant 0 : index
    %c0_1 = arith.constant 0 : index
    %3 = vector.load %arg8[%c0, %c0_1] : memref<8x4xf32, #tpu.memory_space<vmem>>, vector<8x4xf32>
    %c0_2 = arith.constant 0 : index
    %c0_3 = arith.constant 0 : index
    %4 = vector.load %arg2[%c0_2, %c0_3] : memref<8x16xf32, #tpu.memory_space<vmem>>, vector<8x16xf32>
    %c0_4 = arith.constant 0 : index
    %c0_5 = arith.constant 0 : index
    %5 = vector.load %arg3[%c0_4, %c0_5] : memref<16x4xf32, #tpu.memory_space<vmem>>, vector<16x4xf32>
    %cst = arith.constant dense<0.000000e+00> : vector<8x4xf32>
    %6 = tpu.matmul %4, %5, %cst {dimension_numbers = #tpu.dot_dimension_numbers<[1], [0], [0], [1], [0, 0, 1, 1], [], []>} : vector<8x16xf32>, vector<16x4xf32>, vector<8x4xf32> -> vector<8x4xf32>
    %7 = arith.addf %3, %6 : vector<8x4xf32>
    %c0_6 = arith.constant 0 : index
    %c0_7 = arith.constant 0 : index
    %8 = vector.load %arg8[%c0_6, %c0_7] : memref<8x4xf32, #tpu.memory_space<vmem>>, vector<8x4xf32>
    tpu.vector_store %arg8[%c0_6, %c0_7], %7 {strides = array<i32>} : memref<8x4xf32, #tpu.memory_space<vmem>>, vector<8x4xf32>,
    %c0_i32_8 = arith.constant 0 : i32
    %9 = arith.cmpi eq, %arg1, %c0_i32_8 : i32
    %10 = arith.extui %9 : i1 to i32
    %c0_i32_9 = arith.constant 0 : i32
    %11 = arith.cmpi ne, %10, %c0_i32_9 : i32
    scf.if %11 {
      %c0_10 = arith.constant 0 : index
      %c0_11 = arith.constant 0 : index
      %12 = vector.load %arg8[%c0_10, %c0_11] : memref<8x4xf32, #tpu.memory_space<vmem>>, vector<8x4xf32>
      %c0_12 = arith.constant 0 : index
      %c0_13 = arith.constant 0 : index
      %13 = vector.load %arg4[%c0_12, %c0_13] : memref<1x4xf32, #tpu.memory_space<vmem>>, vector<1x4xf32>
      %14 = vector.broadcast %13 : vector<1x4xf32> to vector<8x4xf32>
      %15 = arith.addf %12, %14 : vector<8x4xf32>
      %cst_14 = arith.constant 0.000000e+00 : f32
      %16 = vector.broadcast %cst_14 : f32 to vector<8x4xf32>
      %17 = arith.maximumf %15, %16 : vector<8x4xf32>
      %c0_15 = arith.constant 0 : index
      %c0_16 = arith.constant 0 : index
      %18 = vector.load %arg5[%c0_15, %c0_16] : memref<4x2xf32, #tpu.memory_space<vmem>>, vector<4x2xf32>
      %cst_17 = arith.constant dense<0.000000e+00> : vector<2x8xf32>
      %19 = tpu.matmul %18, %17, %cst_17 {dimension_numbers = #tpu.dot_dimension_numbers<[0], [1], [1], [0], [0, 1, 1, 0], [], []>} : vector<4x2xf32>, vector<8x4xf32>, vector<2x8xf32> -> vector<2x8xf32>
      %c0_18 = arith.constant 0 : index
      %c0_19 = arith.constant 0 : index
      %20 = vector.load %arg6[%c0_18, %c0_19] : memref<2x1xf32, #tpu.memory_space<vmem>>, vector<2x1xf32>
      %21 = vector.broadcast %20 : vector<2x1xf32> to vector<2x8xf32>
      %22 = arith.addf %19, %21 : vector<2x8xf32>
      %23 = tpu.iota {dimensions = array<i32: 0>} : vector<2x8xi32>
      %c1_i32 = arith.constant 1 : i32
      %24 = vector.broadcast %c1_i32 : i32 to vector<2x8xi32>
      %25 = arith.cmpi eq, %23, %24 : vector<2x8xi32>
      %26 = math.absf %22 : vector<2x8xf32>
      %cst_20 = arith.constant 0.000000e+00 : f32
      %27 = vector.broadcast %cst_20 : f32 to vector<2x8xf32>
      %28 = arith.subf %27, %26 : vector<2x8xf32>
      %29 = math.exp %28 : vector<2x8xf32>
      %30 = math.log1p %29 : vector<2x8xf32>
      %cst_21 = arith.constant 0.000000e+00 : f32
      %31 = vector.broadcast %cst_21 : f32 to vector<2x8xf32>
      %32 = arith.maximumf %22, %31 : vector<2x8xf32>
      %33 = arith.addf %30, %32 : vector<2x8xf32>
      %34 = arith.select %25, %33, %22 : vector<2x8xi1>, vector<2x8xf32>
      %c0_22 = arith.constant 0 : index
      %c0_23 = arith.constant 0 : index
      %35 = vector.load %arg7[%c0_22, %c0_23] : memref<2x8xf32, #tpu.memory_space<vmem>>, vector<2x8xf32>
      tpu.vector_store %arg7[%c0_22, %c0_23], %34 {strides = array<i32>} : memref<2x8xf32, #tpu.memory_space<vmem>>, vector<2x8xf32>,
    } else {
    }
    return
  }
  func.func @transform_0(%arg0: i32, %arg1: i32) -> (i32, i32) {
    %c0_i32 = arith.constant 0 : i32
    return %arg0, %arg1 : i32, i32
  }
  func.func @transform_1(%arg0: i32, %arg1: i32) -> (i32, i32) {
    %c0_i32 = arith.constant 0 : i32
    %c0_i32_0 = arith.constant 0 : i32
    %c0_i32_1 = arith.constant 0 : i32
    return %c0_i32, %c0_i32_0 : i32, i32
  }
  func.func @transform_2(%arg0: i32, %arg1: i32) -> (i32, i32) {
    %c0_i32 = arith.constant 0 : i32
    %c0_i32_0 = arith.constant 0 : i32
    %c0_i32_1 = arith.constant 0 : i32
    return %c0_i32, %c0_i32_0 : i32, i32
  }
  func.func @transform_3(%arg0: i32, %arg1: i32) -> (i32, i32) {
    %c0_i32 = arith.constant 0 : i32
    %c0_i32_0 = arith.constant 0 : i32
    %c0_i32_1 = arith.constant 0 : i32
    return %c0_i32, %c0_i32_0 : i32, i32
  }
  func.func @transform_4(%arg0: i32, %arg1: i32) -> (i32, i32) {
    %c0_i32 = arith.constant 0 : i32
    %c0_i32_0 = arith.constant 0 : i32
    %c0_i32_1 = arith.constant 0 : i32
    return %c0_i32, %c0_i32_0 : i32, i32
  }
  func.func @transform_5(%arg0: i32, %arg1: i32) -> (i32, i32) {
    %c0_i32 = arith.constant 0 : i32
    %c0_i32_0 = arith.constant 0 : i32
    return %c0_i32, %arg0 : i32, i32
  }
}

</mosaic_0001>

<bundles_post_ra>
// kernel: tpu_custom_call.1
= control target key start
LH: loop header
LB: loop body
LE: loop exit
PB: predicated region body
PF: predicated region fallthrough
CT: control target
= control target key end

     0   :  { %v323_v1 = vmov 0.0   ;;  %vm324_vm0 = vmmov 0   ;;  %vm25_vm1 = vcmask 31744   ;;  %s382_s0 = inlined_call_operand.vmem [shape: f32[8,16], index: 0, kind: input, shape index: {}]   ;;  %s383_s1 = inlined_call_operand.vmem [shape: f32[16,4], index: 1, kind: input, shape index: {}]   ;;  %s384_s2 = inlined_call_operand.vmem [shape: f32[1,4], index: 2, kind: input, shape index: {}]   ;;  %s385_s3 = inlined_call_operand.vmem [shape: f32[4,2], index: 3, kind: input, shape index: {}]   ;;  %s386_s4 = inlined_call_operand.vmem [shape: f32[2,1], index: 4, kind: input, shape index: {}]   ;;  %s387_s5 = inlined_call_operand.hbm [shape: f32[2,8], index: 5, kind: output, shape index: {}]  }
   0x1   :  { %v30_v0 = vld [vmem:[%s383_s1 + $0x8] sm:$0xff]  ;;  %280 = vmatprep.subr.mxu0 %v323_v1  ;;  %v29_v2 = vld [vmem:[%s383_s1] sm:$0xff]  ;;  %284 = vmatprep.mubr.msk.f32.mxu0 %vm324_vm0, %v323_v1 }
   0x2   :  { %v121_v3 = vld [vmem:[%s385_s3] sm:$0xf] }
   0x3   :  { %10 = vsyncpa [#allocation4], 0  ;;  %281 = vmatpush3.msra.mxu0 %v30_v0  ;;  %v28_v4 = vld [vmem:[%s382_s0] sm:$0xff]  ;;  %vm31_vm2 = vcmask 130048   ;;  %128 = vxpose.xlu0.b32.start.end [1/1] (short) (narrow) %v121_v3, 8  ;;  %26 = vst.msk [vmem:[#allocation2] sm:$0xff] %vm25_vm1, %v323_v1  ;;  %v236_v26 = vlaneseq }
   0x4   :  { %282 = vmatprep.subr.mxu0 %v323_v1  ;;  %287 = vmatprep.subr.mxu1 %v323_v1  ;;  %v122_v5 = vld [vmem:[%s386_s4] sm:$0x3]  ;;  %v325_v6 = vmov 0   ;;  %vm255_vm5 = vcmask 58368  }
   0x5   :  { %283 = vmatpush3.msra.mxu0 %v29_v2  ;;  %289 = vmatprep.mubr.msk.f32.mxu1 %vm324_vm0, %v323_v1  ;;  %v272_v11 = vld [vmem:[%s384_s2] ss:$0 sm:$0xff]  ;;  %v237_v29 = vshrl.u32 %v236_v26, 7  ;;  %s326_s2 = smov [#allocation3]  }
   0x6   :  { %285 = vmatmul.mubr.msk.f32.vlgmr.msra.gmra.mxu0 %vm31_vm2, %v28_v4  ;;  %s263_s4 = sshll.u32 %s326_s2, 4  ;;  %s264_s4 = int_to_ptr.vmem [resolvable:$true] %s263_s4 }
   0x7   :  { %vm238_vm4 = vcmp.eq.s32.totalorder %v237_v29, 1  ;;  %s301_s27 = scalar_lea.vmem %s264_s4, 32  ;;  %p306_p1 = scmp.lt.s32.totalorder %s264_s4, %s264_s4 }
   0x8   :  { %p302_p0 = scmp.ne.s32.totalorder %s264_s4, %s301_s27  ;;  %p307_p2 = scmp.lt.s32.totalorder %s301_s27, %s301_s27 }
   0xa   :  { %v27_v7 = vld [vmem:[#allocation2] sm:$0xff]  ;;  %p308_p3 = por %p307_p2, %p306_p1 }
   0xc   :  { %p309_p4 = pnand %p308_p3, %p302_p0 }
  0x2c   :  { %296 = vset.pattern.permute.xlu0 %v325_v6 }
  0x2d   :  { %125 = vperm.xlu0 %296, %v122_v5  }
  0x7f   :  { %v144_v15 = vpop.trf.xlu0 }
  0xa8   :  { %v126_v16 = vpop.permute.xlu0 %125 }
  0xc6   :  { %v101_v8 = vpop.f32.mrf.mxu0 }
  0xc7   :  { %v105_v9 = vadd.f32 %v101_v8, %v27_v7 }
  0xc8   :  { %v286_v10 = vpop.f32.mrf.mxu0 }
  0xc9   :  { %107 = vst.msk [vmem:[#allocation2] sm:$0xff] %vm25_vm1, %v105_v9 }
  0xd0   :  { %v111_v12 = vld [vmem:[#allocation2] sm:$0xff] }
  0xd1   :  { %v119_v13 = vadd.f32 %v272_v11, %v111_v12 }
  0xd3   :  { %v120_v14 = vmax.f32 %v119_v13, 0.0 }
  0xd5   :  { %288 = vmatpush3.xpose.msk.msra.mxu1 %vm25_vm1, %v120_v14 }
  0xd8   :  { %290 = vmatmul.mubr.msk.f32.vlgmr.msra.gmra.mxu1 %vm25_vm1, %v144_v15 }
 0x198   :  { %v232_v17 = vpop.f32.mrf.mxu1 }
 0x199   :  { %v233_v18 = vadd.f32 %v232_v17, %v126_v16 }
 0x19a   :  { %v291_v19 = vpop.f32.mrf.mxu1 }
 0x19b   :  { %v239_v20 = vand.u32 2147483647, %v233_v18  ;;  %v252_v33 = vmax.f32 %v233_v18, 0.0 }
 0x19d   :  { %v240_v21 = vsub.f32 0.0, %v239_v20 }
 0x19f   :  { %v241_v22 = vmul.f32 1.442695, %v240_v21 }
 0x1a1   :  { %297 = vpow2.f32 %v241_v22 }
 0x1ae   :  { %v298_v23 = vpop.eup %297 }
 0x1af   :  { %v243_v24 = vadd.f32 1.0, %v298_v23  ;;  %v246_v25 = vmul.f32 -0.5, %v298_v23  ;;  %v249_v28 = vand.u32 2147483647, %v298_v23 }
 0x1b1   :  { %299 = vlog2.f32 %v243_v24  ;;  %v247_v27 = vadd.f32 1.0, %v246_v25  ;;  %vm250_vm3 = vcmp.lt.f32.partialorder %v249_v28, 0.0004427343 }
 0x1b3   :  { %v248_v32 = vmul.f32 %v298_v23, %v247_v27 }
 0x1be   :  { %v300_v30 = vpop.eup %299 }
 0x1bf   :  { %v245_v31 = vmul.f32 0.6931472, %v300_v30 }
 0x1c1   :  { %v251_v34 = vsel %vm250_vm3, %v248_v32, %v245_v31 }
 0x1c2   :  { %v253_v35 = vadd.f32 %v252_v33, %v251_v34 }
 0x1c4   :  { %v254_v36 = vsel %vm238_vm4, %v253_v35, %v233_v18 }
 0x1c5   :  { %256 = vst.msk [vmem:[#allocation3] sm:$0x3] %vm255_vm5, %v254_v36 }
 0x1c6   :  { %312 = shalt.err (!%p309_p4)
}
 0x1c7   :  { %266 = dma.vmem_to_hbm [thread:$0]  %s264_s4, 32, %s387_s5, [#allocation4]  }
 0x1c8   :  { %321 = dma.done.wait [#allocation4], 32  }
 0x1c9   :  { %322 = vsyncadd [#allocation4], 4294967264 }
 0x1ca   :  { %270 = vsyncpa [#allocation4], 1 }

// kernel: tpu_custom_call.1
= control target key start
LH: loop header
LB: loop body
LE: loop exit
PB: predicated region body
PF: predicated region fallthrough
CT: control target
= control target key end

     0   :  { %v323_v1 = vmov 0.0   ;;  %vm324_vm0 = vmmov 0   ;;  %vm25_vm1 = vcmask 31744   ;;  %s382_s0 = inlined_call_operand.vmem [shape: f32[8,16], index: 0, kind: input, shape index: {}]   ;;  %s383_s1 = inlined_call_operand.vmem [shape: f32[16,4], index: 1, kind: input, shape index: {}]   ;;  %s384_s2 = inlined_call_operand.vmem [shape: f32[1,4], index: 2, kind: input, shape index: {}]   ;;  %s385_s3 = inlined_call_operand.vmem [shape: f32[4,2], index: 3, kind: input, shape index: {}]   ;;  %s386_s4 = inlined_call_operand.vmem [shape: f32[2,1], index: 4, kind: input, shape index: {}]   ;;  %s387_s5 = inlined_call_operand.hbm [shape: f32[2,8], index: 5, kind: output, shape index: {}]  }
   0x1   :  { %v30_v0 = vld [vmem:[%s383_s1 + $0x8] sm:$0xff]  ;;  %280 = vmatprep.subr.mxu0 %v323_v1  ;;  %v29_v2 = vld [vmem:[%s383_s1] sm:$0xff]  ;;  %284 = vmatprep.mubr.msk.f32.mxu0 %vm324_vm0, %v323_v1 }
   0x2   :  { %v121_v3 = vld [vmem:[%s385_s3] sm:$0xf] }
   0x3   :  { %10 = vsyncpa [#allocation4], 0  ;;  %281 = vmatpush3.msra.mxu0 %v30_v0  ;;  %v28_v4 = vld [vmem:[%s382_s0] sm:$0xff]  ;;  %vm31_vm2 = vcmask 130048   ;;  %128 = vxpose.xlu0.b32.start.end [1/1] (short) (narrow) %v121_v3, 8  ;;  %26 = vst.msk [vmem:[#allocation2] sm:$0xff] %vm25_vm1, %v323_v1  ;;  %v236_v26 = vlaneseq }
   0x4   :  { %282 = vmatprep.subr.mxu0 %v323_v1  ;;  %287 = vmatprep.subr.mxu1 %v323_v1  ;;  %v122_v5 = vld [vmem:[%s386_s4] sm:$0x3]  ;;  %v325_v6 = vmov 0   ;;  %vm255_vm5 = vcmask 58368  }
   0x5   :  { %283 = vmatpush3.msra.mxu0 %v29_v2  ;;  %289 = vmatprep.mubr.msk.f32.mxu1 %vm324_vm0, %v323_v1  ;;  %v272_v11 = vld [vmem:[%s384_s2] ss:$0 sm:$0xff]  ;;  %v237_v29 = vshrl.u32 %v236_v26, 7  ;;  %s326_s2 = smov [#allocation3]  }
   0x6   :  { %285 = vmatmul.mubr.msk.f32.vlgmr.msra.gmra.mxu0 %vm31_vm2, %v28_v4  ;;  %s263_s4 = sshll.u32 %s326_s2, 4  ;;  %s264_s4 = int_to_ptr.vmem [resolvable:$true] %s263_s4 }
   0x7   :  { %vm238_vm4 = vcmp.eq.s32.totalorder %v237_v29, 1  ;;  %s301_s27 = scalar_lea.vmem %s264_s4, 32  ;;  %p306_p1 = scmp.lt.s32.totalorder %s264_s4, %s264_s4 }
   0x8   :  { %p302_p0 = scmp.ne.s32.totalorder %s264_s4, %s301_s27  ;;  %p307_p2 = scmp.lt.s32.totalorder %s301_s27, %s301_s27 }
   0xa   :  { %v27_v7 = vld [vmem:[#allocation2] sm:$0xff]  ;;  %p308_p3 = por %p307_p2, %p306_p1 }
   0xc   :  { %p309_p4 = pnand %p308_p3, %p302_p0 }
  0x2c   :  { %296 = vset.pattern.permute.xlu0 %v325_v6 }
  0x2d   :  { %125 = vperm.xlu0 %296, %v122_v5  }
  0x7f   :  { %v144_v15 = vpop.trf.xlu0 }
  0xa8   :  { %v126_v16 = vpop.permute.xlu0 %125 }
  0xc6   :  { %v101_v8 = vpop.f32.mrf.mxu0 }
  0xc7   :  { %v105_v9 = vadd.f32 %v101_v8, %v27_v7 }
  0xc8   :  { %v286_v10 = vpop.f32.mrf.mxu0 }
  0xc9   :  { %107 = vst.msk [vmem:[#allocation2] sm:$0xff] %vm25_vm1, %v105_v9 }
  0xd0   :  { %v111_v12 = vld [vmem:[#allocation2] sm:$0xff] }
  0xd1   :  { %v119_v13 = vadd.f32 %v272_v11, %v111_v12 }
  0xd3   :  { %v120_v14 = vmax.f32 %v119_v13, 0.0 }
  0xd5   :  { %288 = vmatpush3.xpose.msk.msra.mxu1 %vm25_vm1, %v120_v14 }
  0xd8   :  { %290 = vmatmul.mubr.msk.f32.vlgmr.msra.gmra.mxu1 %vm25_vm1, %v144_v15 }
 0x198   :  { %v232_v17 = vpop.f32.mrf.mxu1 }
 0x199   :  { %v233_v18 = vadd.f32 %v232_v17, %v126_v16 }
 0x19a   :  { %v291_v19 = vpop.f32.mrf.mxu1 }
 0x19b   :  { %v239_v20 = vand.u32 2147483647, %v233_v18  ;;  %v252_v33 = vmax.f32 %v233_v18, 0.0 }
 0x19d   :  { %v240_v21 = vsub.f32 0.0, %v239_v20 }
 0x19f   :  { %v241_v22 = vmul.f32 1.442695, %v240_v21 }
 0x1a1   :  { %297 = vpow2.f32 %v241_v22 }
 0x1ae   :  { %v298_v23 = vpop.eup %297 }
 0x1af   :  { %v243_v24 = vadd.f32 1.0, %v298_v23  ;;  %v246_v25 = vmul.f32 -0.5, %v298_v23  ;;  %v249_v28 = vand.u32 2147483647, %v298_v23 }
 0x1b1   :  { %299 = vlog2.f32 %v243_v24  ;;  %v247_v27 = vadd.f32 1.0, %v246_v25  ;;  %vm250_vm3 = vcmp.lt.f32.partialorder %v249_v28, 0.0004427343 }
 0x1b3   :  { %v248_v32 = vmul.f32 %v298_v23, %v247_v27 }
 0x1be   :  { %v300_v30 = vpop.eup %299 }
 0x1bf   :  { %v245_v31 = vmul.f32 0.6931472, %v300_v30 }
 0x1c1   :  { %v251_v34 = vsel %vm250_vm3, %v248_v32, %v245_v31 }
 0x1c2   :  { %v253_v35 = vadd.f32 %v252_v33, %v251_v34 }
 0x1c4   :  { %v254_v36 = vsel %vm238_vm4, %v253_v35, %v233_v18 }
 0x1c5   :  { %256 = vst.msk [vmem:[#allocation3] sm:$0x3] %vm255_vm5, %v254_v36 }
 0x1c6   :  { %312 = shalt.err (!%p309_p4)
}
 0x1c7   :  { %266 = dma.vmem_to_hbm [thread:$0]  %s264_s4, 32, %s387_s5, [#allocation4]  }
 0x1c8   :  { %321 = dma.done.wait [#allocation4], 32  }
 0x1c9   :  { %322 = vsyncadd [#allocation4], 4294967264 }
 0x1ca   :  { %270 = vsyncpa [#allocation4], 1 }

</bundles_post_ra>
